<compile_context>
chip_gen: v5e
topology: v5e:2x2
jax: 0.10.0
libtpu: 0.0.40
codegen_flags: <defaults>
</compile_context>

<pallas_src>
import jax
import jax.numpy as jnp
from jax.experimental import pallas as pl
from jax.experimental.pallas import tpu as pltpu


# ----------------------------------------------------------------------------
# Channel-tile selection: biggest lane-aligned tile whose (TC, L) block stays
# around `target_bytes` (keeps double-buffered VMEM small on v5e/v7x, avoids
# per-step-overhead domination from over-tiling).
# ----------------------------------------------------------------------------
def _pick_channel_tile(num_ch, length, itemsize, target_bytes=2 << 20):
    if num_ch * length * itemsize <= target_bytes:
        return num_ch
    for tc in (1024, 512, 256, 128):
        if num_ch % tc == 0 and tc * length * itemsize <= target_bytes:
            return tc
    for tc in (128, 256, 512, 1024):   # nothing fits target: smallest aligned divisor
        if num_ch % tc == 0:
            return tc
    return num_ch


# ----------------------------------------------------------------------------
# Kernel 1a: fast pathway — gaze-weighted global average pool.
#   feat block (1, TC, L), att block (1, 1, L), out block (1, 1, TC)
# ----------------------------------------------------------------------------
def _make_fast_pool_kernel(inv_len):
    def kernel(feat_ref, att_ref, out_ref):
        feat = feat_ref[0].astype(jnp.float32)          # (TC, L)
        att = att_ref[0].astype(jnp.float32)            # (1, L)
        out_ref[0, 0, :] = jnp.sum(feat * att, axis=-1) * inv_len
    return kernel


# ----------------------------------------------------------------------------
# Kernel 1b: slow pathway — plain global average pool for all channels, with
# only the single "bug" channel (C_fast - 1) corrected by the pre-powered gaze
# map.  The correction (one (1, L) row multiply+reduce plus a (TC, 1) select)
# is gated with pl.when so only the tile containing the bug channel pays it.
# ----------------------------------------------------------------------------
def _make_slow_pool_kernel(inv_len, tile_c, bug_tile, bug_local):
    def kernel(feat_ref, att_ref, out_ref):
        feat = feat_ref[0].astype(jnp.float32)                       # (TC, L)
        sums = jnp.sum(feat, axis=-1, keepdims=True)                 # (TC, 1)
        out_ref[0, 0, :] = sums[:, 0] * inv_len

        @pl.when(pl.program_id(1) == bug_tile)
        def _():
            att = att_ref[0].astype(jnp.float32)                     # (1, L), already ** C_slow
            row = feat_ref[0, bug_local:bug_local + 1, :].astype(jnp.float32)  # (1, L)
            corrected = jnp.sum(row * att, axis=-1, keepdims=True)   # (1, 1)
            lc = jax.lax.broadcasted_iota(jnp.int32, (tile_c, 1), 0)
            fixed = jnp.where(lc == bug_local, corrected, sums)      # (TC, 1)
            out_ref[0, 0, :] = fixed[:, 0] * inv_len
    return kernel


def _gaze_pool(feat, att, *, slow_bug_channel=None):
    """feat (N, C, T, H, W), att (N, T, H, W) -> (N, C) float32 pooled features."""
    N, C, T, H, W = feat.shape
    L = T * H * W
    tc = _pick_channel_tile(C, L, feat.dtype.itemsize)
    feat2 = feat.reshape(N, C, L)
    att2 = att.reshape(N, 1, L)
    inv_len = 1.0 / float(L)

    if slow_bug_channel is None:
        kernel = _make_fast_pool_kernel(inv_len)
    else:
        kernel = _make_slow_pool_kernel(inv_len, tc,
                                        slow_bug_channel // tc,
                                        slow_bug_channel % tc)

    out = pl.pallas_call(
        kernel,
        out_shape=jax.ShapeDtypeStruct((N, 1, C), jnp.float32),
        grid=(N, C // tc),
        in_specs=[
            pl.BlockSpec((1, tc, L), lambda n, c: (n, c, 0)),
            pl.BlockSpec((1, 1, L), lambda n, c: (n, 0, 0)),
        ],
        out_specs=pl.BlockSpec((1, 1, tc), lambda n, c: (n, 0, c)),
        compiler_params=pltpu.CompilerParams(
            dimension_semantics=("parallel", "parallel")),
    )(feat2, att2)
    return out.reshape(N, C)


# ----------------------------------------------------------------------------
# Kernel 2: head — fused concat (via split weights) + Linear + Softmax (eval).
# ----------------------------------------------------------------------------
def _make_head_kernel(apply_softmax):
    def kernel(xs_ref, xf_ref, ws_ref, wf_ref, b_ref, o_ref):
        logits = (jnp.dot(xs_ref[...], ws_ref[...], preferred_element_type=jnp.float32)
                  + jnp.dot(xf_ref[...], wf_ref[...], preferred_element_type=jnp.float32)
                  + b_ref[...])
        if apply_softmax:
            m = jnp.max(logits, axis=-1, keepdims=True)
            e = jnp.exp(logits - m)
            logits = e / jnp.sum(e, axis=-1, keepdims=True)
        o_ref[...] = logits
    return kernel


def head_projection(slow_pooled, fast_pooled, w_slow_t, w_fast_t, bias_row,
                    *, training=False):
    N, Cs = slow_pooled.shape
    Cf = fast_pooled.shape[1]
    K = w_slow_t.shape[1]
    return pl.pallas_call(
        _make_head_kernel(apply_softmax=not training),
        out_shape=jax.ShapeDtypeStruct((N, K), jnp.float32),
        grid=(1,),
        in_specs=[
            pl.BlockSpec((N, Cs), lambda i: (0, 0)),
            pl.BlockSpec((N, Cf), lambda i: (0, 0)),
            pl.BlockSpec((Cs, K), lambda i: (0, 0)),
            pl.BlockSpec((Cf, K), lambda i: (0, 0)),
            pl.BlockSpec((1, K), lambda i: (0, 0)),
        ],
        out_specs=pl.BlockSpec((N, K), lambda i: (0, 0)),
    )(slow_pooled, fast_pooled, w_slow_t, w_fast_t, bias_row)


def prepare_head_params(proj_w, proj_b, c_slow, c_fast):
    """Hoisted out of the per-call path: split the torch-layout Linear weight
    (K, C_slow + C_fast) into pre-transposed slow/fast halves + a row bias."""
    w_slow_t = jnp.asarray(proj_w[:, :c_slow]).T.astype(jnp.float32)                 # (Cs, K)
    w_fast_t = jnp.asarray(proj_w[:, c_slow:c_slow + c_fast]).T.astype(jnp.float32)  # (Cf, K)
    bias_row = jnp.asarray(proj_b).reshape(1, -1).astype(jnp.float32)                # (1, K)
    return w_slow_t, w_fast_t, bias_row


# ----------------------------------------------------------------------------
# SlowFastGazeAtt head forward (gaze_attention + ResNetModBasicHead).
# ----------------------------------------------------------------------------
def slowfast_gaze_att_forward(slow, fast, gaze_attention_maps, head_params,
                              *, training=False):
    N, Cs, Ts, H, W = slow.shape
    _, Cf, Tf, _, _ = fast.shape
    sampling_factor = 4
    assert Tf == sampling_factor * Ts, "fast T must be alpha * slow T (alpha=4)"
    # The reference indexes slow channel (C_fast - 1); it must exist (else PyTorch
    # would raise an index error — do not silently no-op).
    assert Cf - 1 < Cs, "bug channel C_fast-1 must be a valid slow-pathway channel"

    # Slow attention map = every 4th fast-frame gaze map, pre-raised to the C_slow-th
    # power on the tiny (N, Ts, H, W) map (log2(Cs) multiplies via integer_pow) instead
    # of C_slow unrolled multiplies inside the kernel.  Note: may differ from the
    # reference's sequential multiplications in the last ulp.
    slow_att_pow = gaze_attention_maps[:, ::sampling_factor].astype(jnp.float32) ** Cs

    fast_pooled = _gaze_pool(fast, gaze_attention_maps)                       # (N, Cf)
    slow_pooled = _gaze_pool(slow, slow_att_pow, slow_bug_channel=Cf - 1)     # (N, Cs)

    # torch.cat(pool_out, 1) (slow first) + Linear + Softmax: concat fused into the
    # projection kernel through split, pre-transposed weights.
    w_slow_t, w_fast_t, bias_row = head_params
    return head_projection(slow_pooled, fast_pooled, w_slow_t, w_fast_t, bias_row,
                           training=training)                                 # (N, K)


# ----------------------------------------------------------------------------
if __name__ == "__main__":
    key = jax.random.PRNGKey(0)
    k1, k2, k3, k4 = jax.random.split(key, 4)

    # Small shapes consistent with a SlowFast head input:
    #   slow: (N, C_slow, T_slow, H, W), fast: (N, C_fast, T_fast = 4*T_slow, H, W)
    N, Cs, Cf = 2, 32, 8
    Ts, Tf, H, W = 2, 8, 4, 4
    num_classes = 16

    slow = jax.random.normal(k1, (N, Cs, Ts, H, W), dtype=jnp.float32)
    fast = jax.random.normal(k2, (N, Cf, Tf, H, W), dtype=jnp.float32)
    gaze_maps = jax.random.uniform(k3, (N, Tf, H, W), dtype=jnp.float32)

    # Deterministic Linear(sum(dim_in), num_classes) params, std=0.01, zero bias.
    proj_w = 0.01 * jax.random.normal(k4, (num_classes, Cs + Cf), dtype=jnp.float32)
    proj_b = jnp.zeros((num_classes,), dtype=jnp.float32)

    head_params = prepare_head_params(proj_w, proj_b, Cs, Cf)
    out = slowfast_gaze_att_forward(slow, fast, gaze_maps, head_params, training=False)
    out = jax.block_until_ready(out)

    # Pure-JAX reference of the same (bug-faithful) semantics.
    att_slow = gaze_maps[:, ::4]
    fast_w = fast * gaze_maps[:, None]
    slow_w = slow.at[:, Cf - 1].multiply(att_slow ** Cs)
    pooled = jnp.concatenate([slow_w.mean(axis=(2, 3, 4)),
                              fast_w.mean(axis=(2, 3, 4))], axis=1)
    ref = jax.nn.softmax(pooled @ proj_w.T + proj_b, axis=-1)

    assert out.shape == (N, num_classes)
    assert bool(jnp.all(jnp.isfinite(out)))
    assert bool(jnp.allclose(out, ref, atol=1e-5, rtol=1e-4))
    print("KERNEL_OK")
</pallas_src>

<mosaic_0001>
module attributes {stable_mosaic.version = 11 : i64} {
  func.func @kernel(%arg0: i32, %arg1: i32, %arg2: memref<1x8x128xf32, #tpu.memory_space<vmem>>, %arg3: memref<1x1x128xf32, #tpu.memory_space<vmem>>, %arg4: memref<1x1x8xf32, #tpu.memory_space<vmem>>) attributes {dimension_semantics = [#tpu.dimension_semantics<parallel>, #tpu.dimension_semantics<parallel>], iteration_bounds = array<i64: 2, 1>, scalar_prefetch = 0 : i64, scratch_operands = 0 : i64, tpu.core_type = #tpu.core_type<tc>, window_params = [{transform_indices = @transform_0, window_bounds = array<i64: 1, 8, 128>}, {transform_indices = @transform_1, window_bounds = array<i64: 1, 1, 128>}, {transform_indices = @transform_2, window_bounds = array<i64: 1, 1, 8>}]} {
    %c0 = arith.constant 0 : index
    %c0_0 = arith.constant 0 : index
    %c0_1 = arith.constant 0 : index
    %0 = vector.load %arg2[%c0, %c0_0, %c0_1] : memref<1x8x128xf32, #tpu.memory_space<vmem>>, vector<1x8x128xf32>
    %1 = vector.shape_cast %0 : vector<1x8x128xf32> to vector<8x128xf32>
    %c0_2 = arith.constant 0 : index
    %c0_3 = arith.constant 0 : index
    %c0_4 = arith.constant 0 : index
    %2 = vector.load %arg3[%c0_2, %c0_3, %c0_4] : memref<1x1x128xf32, #tpu.memory_space<vmem>>, vector<1x1x128xf32>
    %3 = vector.shape_cast %2 : vector<1x1x128xf32> to vector<1x128xf32>
    %4 = vector.broadcast %3 : vector<1x128xf32> to vector<8x128xf32>
    %5 = arith.mulf %1, %4 : vector<8x128xf32>
    %cst = arith.constant dense<0.000000e+00> : vector<8xf32>
    %6 = vector.multi_reduction <add>, %5, %cst [1] : vector<8x128xf32> to vector<8xf32>
    %cst_5 = arith.constant 7.812500e-03 : f32
    %7 = vector.broadcast %cst_5 : f32 to vector<8xf32>
    %8 = arith.mulf %6, %7 : vector<8xf32>
    %c0_6 = arith.constant 0 : index
    %c0_7 = arith.constant 0 : index
    %c0_8 = arith.constant 0 : index
    %9 = vector.load %arg4[%c0_6, %c0_7, %c0_8] : memref<1x1x8xf32, #tpu.memory_space<vmem>>, vector<1x1x8xf32>
    %10 = vector.shape_cast %9 : vector<1x1x8xf32> to vector<8xf32>
    %11 = vector.shape_cast %8 : vector<8xf32> to vector<1x1x8xf32>
    tpu.vector_store %arg4[%c0_6, %c0_7, %c0_8], %11 {strides = array<i32>} : memref<1x1x8xf32, #tpu.memory_space<vmem>>, vector<1x1x8xf32>,
    return
  }
  func.func @transform_0(%arg0: i32, %arg1: i32) -> (i32, i32, i32) {
    %c0_i32 = arith.constant 0 : i32
    %c0_i32_0 = arith.constant 0 : i32
    return %arg0, %arg1, %c0_i32 : i32, i32, i32
  }
  func.func @transform_1(%arg0: i32, %arg1: i32) -> (i32, i32, i32) {
    %c0_i32 = arith.constant 0 : i32
    %c0_i32_0 = arith.constant 0 : i32
    %c0_i32_1 = arith.constant 0 : i32
    return %arg0, %c0_i32, %c0_i32_0 : i32, i32, i32
  }
  func.func @transform_2(%arg0: i32, %arg1: i32) -> (i32, i32, i32) {
    %c0_i32 = arith.constant 0 : i32
    %c0_i32_0 = arith.constant 0 : i32
    return %arg0, %c0_i32, %arg1 : i32, i32, i32
  }
}

</mosaic_0001>

<bundles_post_ra>
// kernel: tpu_custom_call.1
= control target key start
LH: loop header
LB: loop body
LE: loop exit
PB: predicated region body
PF: predicated region fallthrough
CT: control target
= control target key end

     0   :  { %7 = vsyncpa [#allocation3], 0  ;;  %s709_s0 = inlined_call_operand.hbm [shape: f32[2,8,128], index: 0, kind: input, shape index: {}]   ;;  %s710_s1 = inlined_call_operand.hbm [shape: f32[2,1,128], index: 1, kind: input, shape index: {}]   ;;  %s711_s2 = inlined_call_operand.hbm [shape: f32[2,1,8], index: 2, kind: output, shape index: {}]  }
   0x1   :  { %9 = vsyncpa [#allocation3 + $0x1], 0 }
   0x2   :  { %10 = vsyncpa [#allocation6], 0 }
   0x3   :  { %12 = vsyncpa [#allocation6 + $0x1], 0 }
   0x4   :  { %13 = vsyncpa [#allocation4], 0 }
   0x5   :  { %15 = vsyncpa [#allocation4 + $0x1], 0  ;;  %s578_s9 = smov 0   ;;  %s580_s10 = smov 0  }
   0x6   :  { %s582_s11 = smov 0   ;;  %s584_s12 = smov 0  }
   0x7   :  { %s586_s13 = smov 0   ;;  %s588_s14 = smov 0  }
   0x8 LB: > { %s337_s15 = sadd.s32 4294967295, %s561_s14   ;;  %s338_s16 = sadd.s32 4294967294, %s561_s14   ;;  %s561_s14 = sphi %s588_s14, %s21_s14   ;;  %s557_s13 = sphi %s586_s13, %s720_s13   ;;  %s553_s12 = sphi %s584_s12, %s719_s12   ;;  %s549_s11 = sphi %s582_s11, %s718_s11   ;;  %s545_s10 = sphi %s580_s10, %s717_s10   ;;  %s541_s9 = sphi %s578_s9, %s716_s9  }
   0x9   : > { %s33_s17 = sadd.s32 1, %s557_s13  ;;  %s42_s18 = sadd.s32 1, %s549_s11 }
   0xa   : > { %p35_p0 = scmp.ge.s32.totalorder %s33_s17, 2  ;;  %p49_p1 = scmp.ne.s32.totalorder %s549_s11, %s545_s10 }
   0xb   : > { %p50_p2 = scmp.eq.s32.totalorder %s561_s14, 0  ;;  %p55_p3 = scmp.ne.s32.totalorder %s545_s10, %s541_s9 }
   0xc   : > { %s722_s17 = smov (%p35_p0, %s33_s17), 0  ;;  %p56_p5 = scmp.eq.s32.totalorder %s337_s15, 0 }
   0xd   : > { %p619_p4 = por %p50_p2, %p49_p1  ;;  %s37_s20 = ssub.s32 %s557_s13, %s722_s17 }
   0xe   : > { %p107_p6 = scmp.eq.s32.totalorder %s337_s15, 1  ;;  %p40_p7 = scmp.eq.s32.totalorder %s37_s20, 0 }
   0xf   : > { %p625_p8 = por %p56_p5, %p55_p3  ;;  %p113_p10 = scmp.eq.s32.totalorder %s338_s16, 1 }
  0x10   : > { %p629_p9 = por %p107_p6, %p49_p1  ;;  %p340_p12 = scmp.ge.s32.totalorder %s561_s14, 2 }
  0x11   : > { %s634_s23 = scalar_select %p40_p7, %s549_s11, %s42_s18  }
  0x12   : > { %p636_p11 = por %p113_p10, %p55_p3  ;;  %p364_p13 = scmp.lt.s32.totalorder %s561_s14, 2 }
  0x13   : > { %s133_s25 = sand.u32 1, %s549_s11   ;;  %s342_s27 = sshll.u32 %s557_s13, 3 }
  0x14   : > { %s341_s26 = sshll.u32 %s133_s25, 3  ;;  %s142_s30 = scalar_lea.hbm %s709_s0, %s342_s27 }
  0x15   : > { %s137_s3 = scalar_lea.vmem [#allocation2], %s341_s26  ;;  %s144_s5 = sshll.u32 %s142_s30, 4  ;;  %s145_s5 = int_to_ptr.hbm [resolvable:$true] %s144_s5 }
  0x16   : > { %s146_s4 = sshll.u32 %s137_s3, 4  ;;  %p354_p0 = pnand %p364_p13, %p619_p4  ;;  %s147_s4 = int_to_ptr.vmem [resolvable:$true] %s146_s4 }
  0x17   : > { %p343_p1 = scmp.ge.s32.totalorder %s561_s14, 1  ;;  %p168_p2 = scmp.lt.s32.totalorder %s561_s14, 3 }
  0x18   : > { %s134_s6 = scalar_lea.sflag [#allocation3], %s133_s25  ;;  %s159_s15 = scalar_lea.hbm %s710_s1, %s557_s13 }
  0x19   : > { %356 = dma.hbm_to_vmem [thread:$0]  (!%p354_p0), %s145_s5, 128, %s147_s4, %s134_s6  }
  0x1a   : > { %p169_p3 = pnand %p343_p1, %p168_p2  ;;  %s156_s16 = scalar_lea.vmem [#allocation5], %s133_s25 }
  0x1b   : > { %s163_s18 = sshll.u32 %s156_s16, 4  ;;  %s161_s20 = sshll.u32 %s159_s15, 4  ;;  %s164_s18 = int_to_ptr.vmem [resolvable:$true] %s163_s18  ;;  %s162_s20 = int_to_ptr.hbm [resolvable:$true] %s161_s20 }
  0x1c   : > { %s154_s26 = scalar_lea.sflag [#allocation6], %s133_s25  ;;  %172 = sbr.rel (%p169_p3) target bundleno = 163 (0xa3), region = 28 }
  0x1d   : > { %359 = dma.hbm_to_vmem [thread:$0]  (!%p354_p0), %s162_s20, 16, %s164_s18, %s154_s26  }
  0x1e   : > { %s656_s19 = sand.u32 (!%p169_p3), 1, %s545_s10  }
  0x1f   : > { %s344_s27 = sshll.u32 (!%p169_p3), %s656_s19, 3  ;;  %s175_s28 = scalar_lea.sflag (!%p169_p3), [#allocation3], %s656_s19 }
  0x20   : > { %s178_s29 = scalar_lea.vmem (!%p169_p3), [#allocation2], %s344_s27 }
  0x21   : > { %528 = dma.done.wait (%p625_p8), %s175_s28, 128  }
  0x22   : > { %530 = vsyncadd (%p625_p8), %s175_s28, 4294967168  ;;  %s185_s25 = scalar_lea.sflag [#allocation6], %s656_s19  ;;  %s187_s30 = scalar_lea.vmem [#allocation5], %s656_s19 }
  0x23   : > { %532 = dma.done.wait (%p625_p8), %s185_s25, 16  }
  0x24   : > { %534 = vsyncadd (%p625_p8), %s185_s25, 4294967280  ;;  %v212_v0 = vld [vmem:[%s178_s29] sm:$0xff]  ;;  %v222_v3 = vlaneseq  ;;  %s238_s5 = scalar_lea.hbm %s711_s2, %s553_s12  ;;  %s211_s6 = scalar_lea.vmem [#allocation7], %s656_s19  ;;  %vm226_vm0 = vcmask 57344  }
  0x25   : > { %v414_v1 = vld [vmem:[%s187_s30] ss:$0 sm:$0xff]  ;;  %s240_s7 = sshll.u32 %s211_s6, 4  ;;  %s242_s8 = sshll.u32 %s238_s5, 4  ;;  %s241_s7 = int_to_ptr.vmem [resolvable:$true] %s240_s7  ;;  %s243_s8 = int_to_ptr.hbm [resolvable:$true] %s242_s8 }
  0x26   : > { %v217_v2 = vmul.f32 %v414_v1, %v212_v0  ;;  %v223_v4 = vand.u32 127, %v222_v3  ;;  %s229_s21 = scalar_lea.sflag [#allocation4], %s656_s19  ;;  %s489_s15 = sshra.s32 %s243_s8, 4  ;;  %s490_s15 = int_to_ptr.hbm [resolvable:$true] %s489_s15 }
  0x27   : > { %s491_s16 = scalar_lea.hbm %s490_s15, 1  ;;  %s495_s20 = scalar_lea.hbm %s711_s2, 2 }
  0x28   : > { %218 = vadd.xlane.f32.xlu0 %v217_v2  ;;  %p492_p4 = scmp.ne.s32.totalorder %s490_s15, %s491_s16  ;;  %p496_p7 = scmp.lt.s32.totalorder %s490_s15, %s711_s2 }
  0x29   : > { %p497_p8 = scmp.lt.s32.totalorder %s495_s20, %s491_s16 }
  0x2a   : > { %p493_p5 = pnand %p492_p4, %p629_p9 }
  0x2b   : > { %p498_p10 = por %p497_p8, %p496_p7 }
  0x2c   : > { %p494_p6 = pneg %p493_p5 }
  0x2e   : > { %p499_p13 = pnand %p498_p10, %p494_p6 }
  0x9b   : > { %v219_v5 = vpop.xlane.xlu0 %218 }
  0x9c   : > { %v220_v6 = vmul.f32 0.0078125, %v219_v5 }
  0x9e   : > { %v224_v7 = vperm.slane %v220_v6, %v223_v4 }
  0xa0   : > { %227 = vst.msk [vmem:[%s211_s6] sm:$0x1] %vm226_vm0, %v224_v7 }
  0xa1   : > { %502 = shalt.err (!%p499_p13)
}
  0xa2   : > { %351 = dma.vmem_to_hbm [thread:$0]  (%p629_p9), %s241_s7, 16, %s243_s8, %s229_s21  }
  0xa3 PF: > { %s254_s19 = sand.u32 1, %s541_s9   ;;  %p361_p0 = pnand %p340_p12, %p636_p11 }
  0xa4   : > { %s255_s28 = scalar_lea.sflag [#allocation4], %s254_s19 }
  0xa5   : > { %p362_p1 = pneg %p361_p0 }
  0xa7   : > { %536 = dma.done.wait (%p362_p1), %s255_s28, 16  }
  0xa8   : > { %538 = vsyncadd (%p362_p1), %s255_s28, 4294967280  ;;  %s21_s14 = sadd.s32 1, %s561_s14   ;;  %s716_s9 = smov %s545_s10 }
  0xa9   : > { %p18_p2 = scmp.ge.s32.totalorder %s21_s14, 4   ;;  %s717_s10 = smov %s549_s11 }
  0xaa   : > { %s718_s11 = smov %s634_s23  ;;  %s719_s12 = smov %s557_s13 }
  0xab   : > { %s720_s13 = smov %s722_s17  ;;  %20 = sbr.rel (!%p18_p2) target bundleno = 8 (0x8), region = 86 }
  0xb0   :  { %260 = vsyncpa [#allocation3], 1 }
  0xb1   :  { %262 = vsyncpa [#allocation3 + $0x1], 1 }
  0xb2   :  { %263 = vsyncpa [#allocation6], 1 }
  0xb3   :  { %265 = vsyncpa [#allocation6 + $0x1], 1 }
  0xb4   :  { %266 = vsyncpa [#allocation4], 1 }
  0xb5   :  { %268 = vsyncpa [#allocation4 + $0x1], 1 }

</bundles_post_ra>
